<compile_context>
chip_gen: v6e
topology: v6e:2x2x1
jax: 0.10.0
libtpu: 0.0.40
codegen_flags: <defaults>
</compile_context>

<pallas_src>
import jax
import jax.numpy as jnp
from jax.experimental import pallas as pl
from jax.experimental.pallas import tpu as pltpu


def dec2enc_kernel(x_ref, w_ref, b_ref, labels_ref, mask_ref,
                   logits_ref, part_ref, acc_ref):
    # Block shapes (per grid step (b, t)):
    #   x_ref:      [1, TILE_S, H]   bf16 hidden-state tile
    #   w_ref:      [2, H]           bf16 nn.Linear weight (channel-first)
    #   b_ref:      [2, 1]           f32 bias
    #   labels_ref: [1, 2, TILE_S]   bf16 (0/1), channel-first
    #   mask_ref:   [1, 1, TILE_S]   bf16 (0/1)
    #   logits_ref: [1, 2, TILE_S]   f32 output tile (lane dense)
    #   part_ref:   [1, 2, 2]        f32 per-batch sums [channel, pos/neg]
    #   acc_ref:    [2, 2]           f32 VMEM accumulator across seq tiles
    t = pl.program_id(1)

    @pl.when(t == 0)
    def _():
        acc_ref[...] = jnp.zeros_like(acc_ref)

    x = x_ref[0]                                   # (TILE_S, H) bf16
    w = w_ref[...]                                 # (2, H)      bf16
    b = b_ref[...]                                 # (2, 1)      f32

    # Channel-first logits (2, TILE_S) = W @ X^T: NT matmul (contraction on H,
    # the lane dim of both operands), f32 accumulation on the MXU.
    logits = jnp.einsum('ch,sh->cs', w, x,
                        preferred_element_type=jnp.float32) + b
    logits_ref[0] = logits

    # ----- ZLPR-style span loss: per-(batch,tile) partial sums (f32) -----
    lab = labels_ref[0].astype(jnp.float32)        # (2, TILE_S)
    m = mask_ref[0].astype(jnp.float32)            # (1, TILE_S)

    li = jnp.clip(logits, -80.0, 80.0)
    # One exp per element: exp(-l) where label==1, exp(+l) elsewhere.
    e = jnp.exp(jnp.where(lab > 0.5, -li, li)) * m
    pos = jnp.sum(e * lab, axis=1, keepdims=True)          # (2, 1)
    neg = jnp.sum(e * (1.0 - lab), axis=1, keepdims=True)  # (2, 1)

    acc_ref[:, 0:1] += pos
    acc_ref[:, 1:2] += neg

    @pl.when(t == pl.num_programs(1) - 1)
    def _():
        part_ref[0] = acc_ref[...]


def _pick_tile_s(s_pad, h, target_bytes):
    """Largest multiple of 128 dividing s_pad whose bf16 x tile <= target_bytes."""
    k = s_pad // 128
    cap = max(1, min(k, target_bytes // (2 * h * 128)))
    for d in range(cap, 0, -1):
        if k % d == 0:
            return d * 128
    return 128


def dec2enc_head(sequence_output, weight, bias, labels, attention_mask,
                 *, x_tile_bytes=4 << 20):
    """Linear head + span loss.

    Returns (logits [B, 2, S] channel-first f32, scalar loss).
    """
    B, S, H = sequence_output.shape

    # Pad the sequence axis to a multiple of 128 (padded tokens are masked out
    # of the loss and sliced off the logits).
    s_pad = -(-S // 128) * 128
    tile_s = _pick_tile_s(s_pad, H, x_tile_bytes)
    T = s_pad // tile_s

    # One-time wrapper-side prep (cheap, O(H) / O(B*S)):
    x = sequence_output.astype(jnp.bfloat16)               # keep bf16, no f32 copy
    labels_cf = jnp.swapaxes(labels, 1, 2).astype(jnp.bfloat16)   # [B, 2, S]
    mask_cf = attention_mask.astype(jnp.bfloat16)[:, None, :]     # [B, 1, S]
    if s_pad != S:
        pad = s_pad - S
        x = jnp.pad(x, ((0, 0), (0, pad), (0, 0)))
        labels_cf = jnp.pad(labels_cf, ((0, 0), (0, 0), (0, pad)))
        mask_cf = jnp.pad(mask_cf, ((0, 0), (0, 0), (0, pad)))

    w_cf = weight.astype(jnp.bfloat16)                      # (2, H) — nn.Linear layout
    b2 = bias.reshape(2, 1).astype(jnp.float32)

    # Explicit VMEM budget: double-buffered x tile dominates; keep well under
    # v7x's 64 MiB physical / all generations' scoped defaults.
    x_bytes = tile_s * H * 2
    aux_bytes = 2 * tile_s * 2 + tile_s * 2 + 2 * tile_s * 4   # labels+mask+logits tiles
    vmem_limit = int(min(48 << 20, max(32 << 20, 4 * (x_bytes + aux_bytes))))

    logits_cf, partials = pl.pallas_call(
        dec2enc_kernel,
        out_shape=(
            jax.ShapeDtypeStruct((B, 2, s_pad), jnp.float32),   # logits (channel-first)
            jax.ShapeDtypeStruct((B, 2, 2), jnp.float32),       # [channel, pos/neg] sums
        ),
        grid_spec=pltpu.PrefetchScalarGridSpec(
            num_scalar_prefetch=0,
            grid=(B, T),
            in_specs=[
                pl.BlockSpec((1, tile_s, H), lambda b, t: (b, t, 0)),
                pl.BlockSpec((2, H), lambda b, t: (0, 0)),
                pl.BlockSpec((2, 1), lambda b, t: (0, 0)),
                pl.BlockSpec((1, 2, tile_s), lambda b, t: (b, 0, t)),
                pl.BlockSpec((1, 1, tile_s), lambda b, t: (b, 0, t)),
            ],
            out_specs=[
                pl.BlockSpec((1, 2, tile_s), lambda b, t: (b, 0, t)),
                pl.BlockSpec((1, 2, 2), lambda b, t: (b, 0, 0)),
            ],
            scratch_shapes=[pltpu.VMEM((2, 2), jnp.float32)],
        ),
        compiler_params=pltpu.CompilerParams(
            dimension_semantics=("parallel", "arbitrary"),
            vmem_limit_bytes=vmem_limit),
    )(x, w_cf, b2, labels_cf, mask_cf)

    if s_pad != S:
        logits_cf = logits_cf[:, :, :S]

    # Finalize in the wrapper: tiny log1p/mean (same formulation as PyTorch).
    pos = partials[:, :, 0]                        # (B, 2)
    neg = partials[:, :, 1]                        # (B, 2)
    loss_per = jnp.log1p(pos) + jnp.log1p(neg)     # (B, 2)
    loss = jnp.sum(jnp.mean(loss_per, axis=0))     # sum over start/end heads
    return logits_cf, loss


def extract_spans(logits_cf):
    """Inference branch of Dec2Enc.forward (labels is None), plain JAX glue.

    PyTorch: best_beg = argmax(logits_s); best_end = argmax(logits_e[best_beg:]) + best_beg
    logits_cf is channel-first [B, 2, S].
    """
    logits_s = logits_cf[:, 0, :]
    logits_e = logits_cf[:, 1, :]
    S = logits_cf.shape[2]
    best_beg = jnp.argmax(logits_s, axis=-1)                       # [B]
    idx = jnp.arange(S)[None, :]
    masked_e = jnp.where(idx >= best_beg[:, None], logits_e, -jnp.inf)
    best_end = jnp.argmax(masked_e, axis=-1)                       # [B]
    return jnp.stack([best_beg, best_end], axis=-1)                # [B, 2]


def _reference(sequence_output, weight, bias, labels, attention_mask):
    """Pure-JAX reference of the head + loss (bf16 matmul, f32 accumulation)."""
    x = sequence_output.astype(jnp.bfloat16)
    w = weight.astype(jnp.bfloat16)                                 # (2, H)
    logits = jnp.einsum('bsh,ch->bsc', x, w,
                        preferred_element_type=jnp.float32)
    logits = logits + bias.reshape(1, 1, 2).astype(jnp.float32)
    mask = attention_mask.astype(jnp.float32)
    labels = labels.astype(jnp.float32)
    loss = 0.0
    for i in range(2):
        li = jnp.clip(logits[:, :, i], -80.0, 80.0)
        lab = labels[:, :, i]
        pos = jnp.sum(jnp.exp(-li) * lab * mask, axis=-1)
        neg = jnp.sum(jnp.exp(li) * (1.0 - lab) * mask, axis=-1)
        loss = loss + jnp.mean(jnp.log1p(pos) + jnp.log1p(neg))
    return logits, loss


if __name__ == "__main__":
    key = jax.random.PRNGKey(0)
    B, S, H, V = 2, 256, 128, 512
    k1, k2, k3, k4, k5 = jax.random.split(key, 5)

    input_ids = jax.random.randint(k1, (B, S), 0, V)
    attention_mask = jnp.ones((B, S), jnp.float32).at[1, 3 * S // 4:].set(0.0)

    # TODO(synk): the pretrained transformer backbone (AutoModel / Llama /
    # Qwen2 / Gemma2 / Mistral) has no in-script equivalent; its last hidden
    # state is synthesized with a deterministic bf16 embedding lookup so the
    # head + loss kernel can run on representative activations.
    embed_table = (jax.random.normal(k2, (V, H), jnp.float32) * 0.02
                   ).astype(jnp.bfloat16)
    sequence_output = embed_table[input_ids]                        # [B, S, H] bf16

    # nn.Linear(hidden_size, 2) parameters, deterministic init.
    weight = jax.random.normal(k3, (2, H), jnp.float32) * 0.02      # [out, in]
    bias = jax.random.normal(k4, (2,), jnp.float32) * 0.02

    # One-hot start/end labels [B, S, 2].
    starts = jax.random.randint(k5, (B,), 0, S // 2)
    ends = starts + 2
    labels = jnp.zeros((B, S, 2), jnp.float32)
    labels = labels.at[jnp.arange(B), starts, 0].set(1.0)
    labels = labels.at[jnp.arange(B), ends, 1].set(1.0)

    head = jax.jit(dec2enc_head)
    logits_cf, loss = head(sequence_output, weight, bias, labels, attention_mask)
    spans = extract_spans(logits_cf)
    jax.block_until_ready((logits_cf, loss, spans))

    # Light correctness check against a pure-JAX reference.
    ref_logits, ref_loss = _reference(sequence_output, weight, bias,
                                      labels, attention_mask)
    logits_bsc = jnp.swapaxes(logits_cf, 1, 2)                      # [B, S, 2]
    assert jnp.allclose(logits_bsc, ref_logits, rtol=1e-2, atol=1e-2), "logits mismatch"
    assert jnp.allclose(loss, ref_loss, rtol=1e-2, atol=1e-3), "loss mismatch"

    print("KERNEL_OK")
</pallas_src>

<mosaic_0001>
module attributes {stable_mosaic.version = 11 : i64} {
  func.func @dec2enc_kernel(%arg0: i32, %arg1: i32, %arg2: memref<1x256x128xbf16, #tpu.memory_space<vmem>>, %arg3: memref<2x128xbf16, #tpu.memory_space<vmem>>, %arg4: memref<2x1xf32, #tpu.memory_space<vmem>>, %arg5: memref<1x2x256xbf16, #tpu.memory_space<vmem>>, %arg6: memref<1x1x256xbf16, #tpu.memory_space<vmem>>, %arg7: memref<1x2x256xf32, #tpu.memory_space<vmem>>, %arg8: memref<1x2x2xf32, #tpu.memory_space<vmem>>, %arg9: memref<2x2xf32, #tpu.memory_space<vmem>>) attributes {dimension_semantics = [#tpu.dimension_semantics<parallel>, #tpu.dimension_semantics<arbitrary>], iteration_bounds = array<i64: 2, 1>, scalar_prefetch = 0 : i64, scratch_operands = 1 : i64, tpu.core_type = #tpu.core_type<tc>, window_params = [{transform_indices = @transform_0, window_bounds = array<i64: 1, 256, 128>}, {pipeline_mode = #tpu.pipeline_mode<synchronous>, transform_indices = @transform_1, window_bounds = array<i64: 2, 128>}, {pipeline_mode = #tpu.pipeline_mode<synchronous>, transform_indices = @transform_2, window_bounds = array<i64: 2, 1>}, {transform_indices = @transform_3, window_bounds = array<i64: 1, 2, 256>}, {transform_indices = @transform_4, window_bounds = array<i64: 1, 1, 256>}, {transform_indices = @transform_5, window_bounds = array<i64: 1, 2, 256>}, {transform_indices = @transform_6, window_bounds = array<i64: 1, 2, 2>}]} {
    %c0_i32 = arith.constant 0 : i32
    %0 = arith.cmpi eq, %arg1, %c0_i32 : i32
    %1 = arith.extui %0 : i1 to i32
    %c0_i32_0 = arith.constant 0 : i32
    %2 = arith.cmpi ne, %1, %c0_i32_0 : i32
    scf.if %2 {
      %cst_32 = arith.constant 0.000000e+00 : f32
      %48 = vector.broadcast %cst_32 : f32 to vector<2x2xf32>
      %c0_33 = arith.constant 0 : index
      %c0_34 = arith.constant 0 : index
      %49 = vector.load %arg9[%c0_33, %c0_34] : memref<2x2xf32, #tpu.memory_space<vmem>>, vector<2x2xf32>
      tpu.vector_store %arg9[%c0_33, %c0_34], %48 {strides = array<i32>} : memref<2x2xf32, #tpu.memory_space<vmem>>, vector<2x2xf32>,
    } else {
    }
    %c0 = arith.constant 0 : index
    %c0_1 = arith.constant 0 : index
    %c0_2 = arith.constant 0 : index
    %3 = vector.load %arg2[%c0, %c0_1, %c0_2] : memref<1x256x128xbf16, #tpu.memory_space<vmem>>, vector<1x256x128xbf16>
    %4 = vector.shape_cast %3 : vector<1x256x128xbf16> to vector<256x128xbf16>
    %c0_3 = arith.constant 0 : index
    %c0_4 = arith.constant 0 : index
    %5 = vector.load %arg3[%c0_3, %c0_4] : memref<2x128xbf16, #tpu.memory_space<vmem>>, vector<2x128xbf16>
    %c0_5 = arith.constant 0 : index
    %c0_6 = arith.constant 0 : index
    %6 = vector.load %arg4[%c0_5, %c0_6] : memref<2x1xf32, #tpu.memory_space<vmem>>, vector<2x1xf32>
    "tpu.trace_start"() <{level = 10 : i32, message = "ch,sh->cs"}> : () -> ()
    %cst = arith.constant dense<0.000000e+00> : vector<2x256xf32>
    %7 = tpu.matmul %5, %4, %cst {dimension_numbers = #tpu.dot_dimension_numbers<[1], [1], [0], [0], [0, 0, 1, 0], [], []>} : vector<2x128xbf16>, vector<256x128xbf16>, vector<2x256xf32> -> vector<2x256xf32>
    "tpu.trace_stop"() : () -> ()
    %8 = vector.broadcast %6 : vector<2x1xf32> to vector<2x256xf32>
    %9 = arith.addf %7, %8 : vector<2x256xf32>
    %c0_7 = arith.constant 0 : index
    %c0_8 = arith.constant 0 : index
    %c0_9 = arith.constant 0 : index
    %10 = vector.load %arg7[%c0_7, %c0_8, %c0_9] : memref<1x2x256xf32, #tpu.memory_space<vmem>>, vector<1x2x256xf32>
    %11 = vector.shape_cast %10 : vector<1x2x256xf32> to vector<2x256xf32>
    %12 = vector.shape_cast %9 : vector<2x256xf32> to vector<1x2x256xf32>
    tpu.vector_store %arg7[%c0_7, %c0_8, %c0_9], %12 {strides = array<i32>} : memref<1x2x256xf32, #tpu.memory_space<vmem>>, vector<1x2x256xf32>,
    %c0_10 = arith.constant 0 : index
    %c0_11 = arith.constant 0 : index
    %c0_12 = arith.constant 0 : index
    %13 = vector.load %arg5[%c0_10, %c0_11, %c0_12] : memref<1x2x256xbf16, #tpu.memory_space<vmem>>, vector<1x2x256xbf16>
    %14 = vector.shape_cast %13 : vector<1x2x256xbf16> to vector<2x256xbf16>
    %15 = arith.extf %14 : vector<2x256xbf16> to vector<2x256xf32>
    %c0_13 = arith.constant 0 : index
    %c0_14 = arith.constant 0 : index
    %c0_15 = arith.constant 0 : index
    %16 = vector.load %arg6[%c0_13, %c0_14, %c0_15] : memref<1x1x256xbf16, #tpu.memory_space<vmem>>, vector<1x1x256xbf16>
    %17 = vector.shape_cast %16 : vector<1x1x256xbf16> to vector<1x256xbf16>
    %18 = arith.extf %17 : vector<1x256xbf16> to vector<1x256xf32>
    %cst_16 = arith.constant -8.000000e+01 : f32
    %cst_17 = arith.constant 8.000000e+01 : f32
    %19 = vector.broadcast %cst_16 : f32 to vector<2x256xf32>
    %20 = arith.maximumf %19, %9 : vector<2x256xf32>
    %21 = vector.broadcast %cst_17 : f32 to vector<2x256xf32>
    %22 = arith.minimumf %21, %20 : vector<2x256xf32>
    %cst_18 = arith.constant 5.000000e-01 : f32
    %23 = vector.broadcast %cst_18 : f32 to vector<2x256xf32>
    %24 = arith.cmpf ogt, %15, %23 : vector<2x256xf32>
    %cst_19 = arith.constant 0.000000e+00 : f32
    %25 = vector.broadcast %cst_19 : f32 to vector<2x256xf32>
    %26 = arith.subf %25, %22 : vector<2x256xf32>
    %27 = arith.select %24, %26, %22 : vector<2x256xi1>, vector<2x256xf32>
    %28 = math.exp %27 : vector<2x256xf32>
    %29 = vector.broadcast %18 : vector<1x256xf32> to vector<2x256xf32>
    %30 = arith.mulf %28, %29 : vector<2x256xf32>
    %31 = arith.mulf %30, %15 : vector<2x256xf32>
    %cst_20 = arith.constant dense<0.000000e+00> : vector<2xf32>
    %32 = vector.multi_reduction <add>, %31, %cst_20 [1] : vector<2x256xf32> to vector<2xf32>
    %33 = vector.shape_cast %32 : vector<2xf32> to vector<2x1xf32>
    %cst_21 = arith.constant 1.000000e+00 : f32
    %34 = vector.broadcast %cst_21 : f32 to vector<2x256xf32>
    %35 = arith.subf %34, %15 : vector<2x256xf32>
    %36 = arith.mulf %30, %35 : vector<2x256xf32>
    %cst_22 = arith.constant dense<0.000000e+00> : vector<2xf32>
    %37 = vector.multi_reduction <add>, %36, %cst_22 [1] : vector<2x256xf32> to vector<2xf32>
    %38 = vector.shape_cast %37 : vector<2xf32> to vector<2x1xf32>
    %c0_23 = arith.constant 0 : index
    %c0_24 = arith.constant 0 : index
    %39 = vector.load %arg9[%c0_23, %c0_24] : memref<2x2xf32, #tpu.memory_space<vmem>>, vector<2x1xf32>
    %40 = arith.addf %39, %33 : vector<2x1xf32>
    %c0_25 = arith.constant 0 : index
    %c0_26 = arith.constant 0 : index
    %41 = vector.load %arg9[%c0_25, %c0_26] : memref<2x2xf32, #tpu.memory_space<vmem>>, vector<2x1xf32>
    tpu.vector_store %arg9[%c0_25, %c0_26], %40 {strides = array<i32>} : memref<2x2xf32, #tpu.memory_space<vmem>>, vector<2x1xf32>,
    %c0_27 = arith.constant 0 : index
    %c1 = arith.constant 1 : index
    %42 = vector.load %arg9[%c0_27, %c1] : memref<2x2xf32, #tpu.memory_space<vmem>>, vector<2x1xf32>
    %43 = arith.addf %42, %38 : vector<2x1xf32>
    %c0_28 = arith.constant 0 : index
    %c1_29 = arith.constant 1 : index
    %44 = vector.load %arg9[%c0_28, %c1_29] : memref<2x2xf32, #tpu.memory_space<vmem>>, vector<2x1xf32>
    tpu.vector_store %arg9[%c0_28, %c1_29], %43 {strides = array<i32>} : memref<2x2xf32, #tpu.memory_space<vmem>>, vector<2x1xf32>,
    %c0_i32_30 = arith.constant 0 : i32
    %45 = arith.cmpi eq, %arg1, %c0_i32_30 : i32
    %46 = arith.extui %45 : i1 to i32
    %c0_i32_31 = arith.constant 0 : i32
    %47 = arith.cmpi ne, %46, %c0_i32_31 : i32
    scf.if %47 {
      %c0_32 = arith.constant 0 : index
      %c0_33 = arith.constant 0 : index
      %48 = vector.load %arg9[%c0_32, %c0_33] : memref<2x2xf32, #tpu.memory_space<vmem>>, vector<2x2xf32>
      %c0_34 = arith.constant 0 : index
      %c0_35 = arith.constant 0 : index
      %c0_36 = arith.constant 0 : index
      %49 = vector.load %arg8[%c0_34, %c0_35, %c0_36] : memref<1x2x2xf32, #tpu.memory_space<vmem>>, vector<1x2x2xf32>
      %50 = vector.shape_cast %49 : vector<1x2x2xf32> to vector<2x2xf32>
      %51 = vector.shape_cast %48 : vector<2x2xf32> to vector<1x2x2xf32>
      tpu.vector_store %arg8[%c0_34, %c0_35, %c0_36], %51 {strides = array<i32>} : memref<1x2x2xf32, #tpu.memory_space<vmem>>, vector<1x2x2xf32>,
    } else {
    }
    return
  }
  func.func @transform_0(%arg0: i32, %arg1: i32) -> (i32, i32, i32) {
    %c0_i32 = arith.constant 0 : i32
    %c0_i32_0 = arith.constant 0 : i32
    return %arg0, %arg1, %c0_i32 : i32, i32, i32
  }
  func.func @transform_1(%arg0: i32, %arg1: i32) -> (i32, i32) {
    %c0_i32 = arith.constant 0 : i32
    %c0_i32_0 = arith.constant 0 : i32
    %c0_i32_1 = arith.constant 0 : i32
    return %c0_i32, %c0_i32_0 : i32, i32
  }
  func.func @transform_2(%arg0: i32, %arg1: i32) -> (i32, i32) {
    %c0_i32 = arith.constant 0 : i32
    %c0_i32_0 = arith.constant 0 : i32
    %c0_i32_1 = arith.constant 0 : i32
    return %c0_i32, %c0_i32_0 : i32, i32
  }
  func.func @transform_3(%arg0: i32, %arg1: i32) -> (i32, i32, i32) {
    %c0_i32 = arith.constant 0 : i32
    %c0_i32_0 = arith.constant 0 : i32
    return %arg0, %c0_i32, %arg1 : i32, i32, i32
  }
  func.func @transform_4(%arg0: i32, %arg1: i32) -> (i32, i32, i32) {
    %c0_i32 = arith.constant 0 : i32
    %c0_i32_0 = arith.constant 0 : i32
    return %arg0, %c0_i32, %arg1 : i32, i32, i32
  }
  func.func @transform_5(%arg0: i32, %arg1: i32) -> (i32, i32, i32) {
    %c0_i32 = arith.constant 0 : i32
    %c0_i32_0 = arith.constant 0 : i32
    return %arg0, %c0_i32, %arg1 : i32, i32, i32
  }
  func.func @transform_6(%arg0: i32, %arg1: i32) -> (i32, i32, i32) {
    %c0_i32 = arith.constant 0 : i32
    %c0_i32_0 = arith.constant 0 : i32
    %c0_i32_1 = arith.constant 0 : i32
    return %arg0, %c0_i32, %c0_i32_0 : i32, i32, i32
  }
}

</mosaic_0001>

<bundles_post_ra>
// kernel: dec2enc_head.1
= control target key start
LH: loop header
LB: loop body
LE: loop exit
PB: predicated region body
PF: predicated region fallthrough
CT: control target
= control target key end

     0   :  { %12 = vsyncpa [#allocation4], 0  ;;  %s1315_s0 = inlined_call_operand.hbm [shape: bf16[2,256,128], index: 0, kind: input, shape index: {}]   ;;  %s1316_s1 = inlined_call_operand.vmem [shape: bf16[2,128], index: 1, kind: input, shape index: {}]   ;;  %s1317_s2 = inlined_call_operand.vmem [shape: f32[2,1], index: 2, kind: input, shape index: {}]   ;;  %s1318_s3 = inlined_call_operand.vmem [shape: bf16[2,2,256], index: 3, kind: input, shape index: {}]   ;;  %s1319_s4 = inlined_call_operand.vmem [shape: bf16[2,1,256], index: 4, kind: input, shape index: {}]   ;;  %s1320_s5 = inlined_call_operand.hbm [shape: f32[2,2,256], index: 5, kind: output, shape index: {0}]   ;;  %s1321_s6 = inlined_call_operand.vmem [shape: f32[2,2,2], index: 6, kind: output, shape index: {1}]  }
   0x1   :  { %14 = vsyncpa [#allocation4 + $0x1], 0 }
   0x2   :  { %15 = vsyncpa [#allocation5], 0 }
   0x3   :  { %17 = vsyncpa [#allocation5 + $0x1], 0  ;;  %s1136_s21 = smov 0   ;;  %s1138_s22 = smov 0  }
   0x4   :  { %s1140_s23 = smov 0   ;;  %s1142_s24 = smov 0  }
   0x5   :  { %s1144_s25 = smov 0   ;;  %s1146_s26 = smov 0  }
   0x6 LB: > { %s841_s27 = sadd.s32 4294967295, %s1092_s26   ;;  %s842_s28 = sadd.s32 4294967294, %s1092_s26   ;;  %s1092_s26 = sphi %s1146_s26, %s23_s26   ;;  %s1088_s25 = sphi %s1144_s25, %s1332_s25   ;;  %s1084_s24 = sphi %s1142_s24, %s1331_s24   ;;  %s1080_s23 = sphi %s1140_s23, %s1330_s23   ;;  %s1076_s22 = sphi %s1138_s22, %s1329_s22   ;;  %s1072_s21 = sphi %s1136_s21, %s1328_s21  }
   0x7   : > { %s35_s29 = sadd.s32 1, %s1088_s25  ;;  %s44_s30 = sadd.s32 1, %s1080_s23 }
   0x8   : > { %p37_p0 = scmp.ge.s32.totalorder %s35_s29, 2  ;;  %p51_p1 = scmp.ne.s32.totalorder %s1080_s23, %s1076_s22 }
   0x9   : > { %p52_p2 = scmp.eq.s32.totalorder %s1092_s26, 0  ;;  %p57_p3 = scmp.ne.s32.totalorder %s1076_s22, %s1072_s21 }
   0xa   : > { %s1334_s29 = smov (%p37_p0, %s35_s29), 0  ;;  %p58_p5 = scmp.eq.s32.totalorder %s841_s27, 0 }
   0xb   : > { %p1177_p4 = por %p52_p2, %p51_p1  ;;  %s39_s8 = ssub.s32 %s1088_s25, %s1334_s29 }
   0xc   : > { %p181_p6 = scmp.eq.s32.totalorder %s841_s27, 1  ;;  %p42_p7 = scmp.eq.s32.totalorder %s39_s8, 0 }
   0xd   : > { %p1183_p8 = por %p58_p5, %p57_p3  ;;  %p187_p10 = scmp.eq.s32.totalorder %s842_s28, 1 }
   0xe   : > { %p1187_p9 = por %p181_p6, %p51_p1  ;;  %p910_p13 = scmp.lt.s32.totalorder %s1092_s26, 2 }
   0xf   : > { %s1192_s11 = scalar_select %p42_p7, %s1080_s23, %s44_s30  }
  0x10   : > { %p1194_p11 = por %p187_p10, %p57_p3  ;;  %s239_s13 = sand.u32 1, %s1080_s23  }
  0x11   : > { %s845_s14 = sshll.u32 %s239_s13, 7  ;;  %s878_s15 = sshll.u32 %s1088_s25, 11 }
  0x12   : > { %s251_s18 = scalar_lea.hbm %s1315_s0, %s878_s15  ;;  %s243_s19 = scalar_lea.vmem [#allocation3], %s845_s14 }
  0x13   : > { %s252_s20 = sshll.u32 %s243_s19, 4  ;;  %p1207_p0 = pnand %p910_p13, %p1177_p4  ;;  %s253_s20 = int_to_ptr.vmem [resolvable:$true] %s252_s20 }
  0x14   : > { %p848_p1 = scmp.ge.s32.totalorder %s1092_s26, 1  ;;  %s240_s28 = scalar_lea.sflag [#allocation4], %s239_s13 }
  0x15   : > { %p986_p2 = pneg %p1207_p0  ;;  %s997_s30 = scalar_lea.vmem %s253_s20, 2048 }
  0x16   : > { %p998_p3 = scmp.ne.s32.totalorder %s253_s20, %s997_s30  ;;  %s1094_s8 = smov [#allocation3]  }
  0x17   : > { %s1002_s16 = sshll.u32 %s1094_s8, 4  ;;  %s1003_s16 = int_to_ptr.vmem [resolvable:$false] %s1002_s16 }
  0x18   : > { %p1000_p5 = pnand %p998_p3, %p986_p2  ;;  %s1004_s14 = scalar_lea.vmem %s1003_s16, 4096 }
  0x19   : > { %p1005_p7 = scmp.lt.s32.totalorder %s253_s20, %s1003_s16  ;;  %p1006_p10 = scmp.lt.s32.totalorder %s1004_s14, %s997_s30 }
  0x1a   : > { %p1001_p6 = pneg %p1000_p5 }
  0x1b   : > { %p1007_p12 = por %p1006_p10, %p1005_p7 }
  0x1d   : > { %p1008_p4 = pnand %p1007_p12, %p1001_p6 }
  0x1f   : > { %1011 = shalt.err (!%p1008_p4)
}
  0x20   : > { %s1095_s7 = smov 64   ;;  %s1096_s13 = smov 4  }
  0x21   : > { %905 = dma.hbm_to_vmem [thread:$0]  (!%p1207_p0), %s251_s18, 2048, %s253_s20, %s240_s28, %s1095_s7, %s1095_s7, %s1096_s13  }
  0x22   : > { %p284_p13 = scmp.lt.s32.totalorder %s1092_s26, 3 }
  0x24   : > { %p285_p2 = pnand %p848_p1, %p284_p13 }
  0x25   : > { %s1220_s15 = sand.u32 (!%p285_p2), 1, %s1076_s22  }
  0x26   : > { %288 = sbr.rel (%p285_p2) target bundleno = 501 (0x1f5), region = 40  ;;  %s849_s17 = sshll.u32 (!%p285_p2), %s1220_s15, 7 }
  0x27   : > { %s291_s19 = scalar_lea.sflag (!%p285_p2), [#allocation4], %s1220_s15  ;;  %s1224_s30 = scalar_lea.vmem (!%p285_p2), [#allocation3], %s849_s17 }
  0x2b   : > { %1063 = dma.done.wait (%p1183_p8), %s291_s19, 2048  }
  0x2c   : > { %1065 = vsyncadd (%p1183_p8), %s291_s19, 4294965248  ;;  %v1097_v0 = vmov 0   ;;  %v966_v1 = vld [vmem:[%s1224_s30 + $0x78] sm:$0xff]   ;;  %v968_v3 = vld [vmem:[%s1224_s30 + $0x70] sm:$0xff]   ;;  %p345_p8 = scmp.lt.s32.totalorder %s1084_s24, 1  ;;  %v579_v22 = vlaneseq  ;;  %s850_s13 = sshll.u32 %s1220_s15, 2 }
  0x2d   : > { %965 = vset.pattern.permute.xlu0 %v1097_v0  ;;  %v967_v2 = vld [vmem:[%s1224_s30 + $0x38] sm:$0xff]   ;;  %880 = vmatprep.subr.bf16.mxu0 %v966_v1  ;;  %v969_v4 = vld [vmem:[%s1224_s30 + $0x30] sm:$0xff]   ;;  %v970_v5 = vld [vmem:[%s1224_s30 + $0x68] sm:$0xff]   ;;  %v1098_v20 = vmov 1983009808   ;;  %s1265_s9 = scalar_lea.vmem [#allocation6], %s850_s13 }
  0x2e   : > { %881 = vmatpush3.bf16.xpose.msra.mxu0 %v967_v2  ;;  %v971_v6 = vld [vmem:[%s1224_s30 + $0x28] sm:$0xff]   ;;  %v972_v7 = vld [vmem:[%s1224_s30 + $0x60] sm:$0xff]   ;;  %v406_v8 = vld [vmem:[%s1316_s1] sm:$0x1]  ;;  %s346_s28 = scalar_select %p345_p8, %s1084_s24, 1  ;;  %v577_v21 = vunpack.c.l.s4 %v1098_v20  ;;  %v580_v30 = vshrl.u32 %v579_v22, 7 }
  0x2f   : > { %882 = vmatprep.subr.bf16.mxu0 %v968_v3  ;;  %v407_v9 = vld [vmem:[%s1317_s2] sm:$0x3]  ;;  %896 = vmatprep.mubr.bf16.mxu0 %v406_v8  ;;  %v973_v10 = vld [vmem:[%s1224_s30 + $0x20] sm:$0xff]   ;;  %v976_v13 = vld [vmem:[%s1224_s30 + $0x50] sm:$0xff]   ;;  %vm641_vm1 = vcmask 1041408   ;;  %vm372_vm2 = vcmask 9216  }
  0x30   : > { %410 = vperm.xlu0 %965, %v407_v9   ;;  %v974_v11 = vld [vmem:[%s1224_s30 + $0x58] sm:$0xff]   ;;  %v977_v14 = vld [vmem:[%s1224_s30 + $0x10] sm:$0xff]   ;;  %v978_v15 = vld [vmem:[%s1224_s30 + $0x48] sm:$0xff]   ;;  %s1254_s8 = sshll.u32 %s346_s28, 1  ;;  %v578_v29 = vunpack.c.0.s8 %v577_v21  ;;  %v601_v43 = vsub.s32 0, %v580_v30  ;;  %v605_v44 = vsub.s32 2, %v580_v30 }
  0x31   : > { %v975_v12 = vld [vmem:[%s1224_s30 + $0x18] sm:$0xff]   ;;  %v979_v16 = vld [vmem:[%s1224_s30 + $0x8] sm:$0xff]   ;;  %v980_v17 = vld [vmem:[%s1224_s30 + $0x40] sm:$0xff]   ;;  %s351_s7 = scalar_lea.vmem %s1318_s3, %s1254_s8  ;;  %s879_s18 = sshll.u32 %s1084_s24, 6 }
  0x32   : > { %v981_v18 = vld [vmem:[%s1224_s30] sm:$0xff]   ;;  %v562_v28 = vld [vmem:[%s351_s7] sm:$0x3]  ;;  %s360_s30 = scalar_lea.vmem %s1319_s4, %s1254_s8  ;;  %v581_v38 = vsub.s32 %v578_v29, %v580_v30  ;;  %s700_s20 = sshll.u32 %s1265_s9, 4  ;;  %s701_s20 = int_to_ptr.vmem [resolvable:$true] %s700_s20 }
  0x33   : > { %v563_v34 = vunpack.c.l.bf16 %v562_v28  ;;  %v564_v40 = vld [vmem:[%s360_s30] sm:$0x3]  ;;  %s698_s16 = scalar_lea.hbm %s1320_s5, %s879_s18  ;;  %s680_s14 = scalar_lea.sflag [#allocation5], %s1220_s15 }
  0x34   : > { %v565_v42 = vunpack.c.l.bf16 %v564_v40  ;;  %s1012_s7 = scalar_lea.vmem %s701_s20, 64  ;;  %s1100_s13 = smov [#allocation6]  }
  0x35   : > { %vm570_vm0 = vcmp.gt.f32.partialorder %v563_v34, 0.5  ;;  %v647_v55 = vsub.f32 1.0, %v563_v34  ;;  %p1013_p12 = scmp.ne.s32.totalorder %s701_s20, %s1012_s7  ;;  %s1016_s17 = sshll.u32 %s1100_s13, 4  ;;  %s1017_s17 = int_to_ptr.vmem [resolvable:$false] %s1016_s17 }
  0x36   : > { %883 = vmatpush3.bf16.xpose.msra.mxu0 %v969_v4  ;;  %v602_v49 = vrot.slane %v565_v42, %v601_v43  ;;  %v606_v50 = vrot.slane %v565_v42, %v605_v44  ;;  %s1018_s19 = scalar_lea.vmem %s1017_s17, 128  ;;  %p1019_p3 = scmp.lt.s32.totalorder %s701_s20, %s1017_s17 }
  0x37   : > { %884 = vmatprep.subr.bf16.mxu0 %v970_v5  ;;  %p1014_p0 = pnand %p1013_p12, %p1187_p9  ;;  %p1020_p5 = scmp.lt.s32.totalorder %s1018_s19, %s1012_s7 }
  0x38   : > { %v612_v51 = vrot.slane %v602_v49, %v601_v43  ;;  %v616_v52 = vrot.slane %v606_v50, %v601_v43 }
  0x39   : > { %p1015_p1 = pneg %p1014_p0  ;;  %p1021_p6 = por %p1020_p5, %p1019_p3 }
  0x3a   : > { %v619_v53 = vcombine.low %v612_v51, %v616_v52 }
  0x3b   : > { %p1022_p7 = pnand %p1021_p6, %p1015_p1 }
  0x3c   : > { %v626_v54 = vrot.slane %v619_v53, %v581_v38 }
  0x3e   : > { %885 = vmatpush3.bf16.xpose.msra.mxu0 %v971_v6  ;;  %v1099_v6 = vmov 0.0  }
  0x3f   : > { %886 = vmatprep.subr.bf16.mxu0 %v972_v7  ;;  %373 = vst.msk [vmem:[#allocation2] sm:$0x3] %vm372_vm2, %v1099_v6 }
  0x46   : > { %887 = vmatpush3.bf16.xpose.msra.mxu0 %v973_v10 }
  0x47   : > { %888 = vmatprep.subr.bf16.mxu0 %v974_v11 }
  0x4e   : > { %889 = vmatpush3.bf16.xpose.msra.mxu0 %v975_v12 }
  0x4f   : > { %890 = vmatprep.subr.bf16.mxu0 %v976_v13 }
  0x56   : > { %891 = vmatpush3.bf16.xpose.msra.mxu0 %v977_v14 }
  0x57   : > { %892 = vmatprep.subr.bf16.mxu0 %v978_v15 }
  0x5e   : > { %893 = vmatpush3.bf16.xpose.msra.mxu0 %v979_v16 }
  0x5f   : > { %894 = vmatprep.subr.bf16.mxu0 %v980_v17 }
  0x66   : > { %895 = vmatpush3.bf16.xpose.msra.mxu0 %v981_v18 }
  0x6d   : > { %897 = vmatmul.mubr.bf16.vlgmr.msra.gmra.mxu0 %v406_v8 }
  0xab   : > { %v411_v19 = vpop.permute.xlu0 %410 }
 0x12d   : > { %v543_v23 = vpop.f32.mrf.mxu0 }
 0x12e   : > { %v544_v24 = vadd.f32 %v543_v23, %v411_v19 }
 0x12f   : > { %v545_v25 = vpop.f32.mrf.mxu0 }
 0x130   : > { %v871_v26 = vclamps-f32 %v544_v24, 80.0  ;;  %v546_v27 = vadd.f32 %v545_v25, %v411_v19 }
 0x131   : > { %v547_v31 = vpop.f32.mrf.mxu0 }
 0x132   : > { %v552_v32 = vcombine.low %v544_v24, %v546_v27  ;;  %v872_v33 = vclamps-f32 %v546_v27, 80.0  ;;  %v571_v36 = vsub.f32 0.0, %v871_v26 }
 0x133   : > { %v548_v35 = vpop.f32.mrf.mxu0 }
 0x134   : > { %v572_v37 = vsub.f32 0.0, %v872_v33  ;;  %v586_v39 = vcombine.low %v871_v26, %v872_v33  ;;  %870 = vst.sshfl [vmem:[%s1265_s9] sm:$0x33 pattern:$0x76325410] %v552_v32 }
 0x136   : > { %v575_v41 = vcombine.low %v571_v36, %v572_v37  ;;  %v593_v46 = vrot.slane %v586_v39, %v581_v38 }
 0x138   : > { %v582_v45 = vrot.slane %v575_v41, %v581_v38 }
 0x13a   : > { %v595_v47 = vsel %vm570_vm0, %v582_v45, %v593_v46 }
 0x13b   : > { %v596_v48 = vmul.f32 1.442695, %v595_v47 }
 0x13d   : > { %982 = vpow2.f32 %v596_v48 }
 0x14a   : > { %v983_v56 = vpop.eup %982 }
 0x14b   : > { %v628_v57 = vmul.f32 %v983_v56, %v626_v54 }
 0x14d   : > { %v648_v58 = vmul.f32 %v647_v55, %v628_v57  ;;  %v629_v59 = vmul.f32 %v628_v57, %v563_v34 }
 0x14f   : > { %v656_v60 = vrot.slane %v648_v58, %v581_v38  ;;  %v637_v61 = vrot.slane %v629_v59, %v581_v38 }
 0x151   : > { %v657_v62 = vcombine.high %v656_v60, %v656_v60  ;;  %v638_v63 = vcombine.high %v637_v61, %v637_v61  ;;  %v660_v0 = vsel %vm641_vm1, %v656_v60, 0.0  ;;  %v642_v2 = vsel %vm641_vm1, %v637_v61, 0.0 }
 0x153   : > { %v661_v1 = vsel %vm641_vm1, %v657_v62, 0.0  ;;  %v643_v3 = vsel %vm641_vm1, %v638_v63, 0.0 }
 0x154   : > { %v662_v4 = vadd.f32 %v661_v1, %v660_v0  ;;  %v644_v5 = vadd.f32 %v643_v3, %v642_v2 }
 0x156   : > { %663 = vadd.xlane.f32.xlu1 %v662_v4  ;;  %645 = vadd.xlane.f32.xlu0 %v644_v5 }
 0x157   : > { %1025 = shalt.err (!%p1022_p7)
}
 0x158   : > { %s1026_s24 = scalar_lea.hbm %s698_s16, 64  ;;  %s1030_s9 = scalar_lea.hbm %s1320_s5, 128 }
 0x159   : > { %p1027_p10 = scmp.ne.s32.totalorder %s698_s16, %s1026_s24  ;;  %p1031_p2 = scmp.lt.s32.totalorder %s698_s16, %s1320_s5 }
 0x15a   : > { %p1032_p8 = scmp.lt.s32.totalorder %s1030_s9, %s1026_s24 }
 0x15b   : > { %p1028_p4 = pnand %p1027_p10, %p1187_p9 }
 0x15c   : > { %p1033_p12 = por %p1032_p8, %p1031_p2 }
 0x15d   : > { %p1029_p13 = pneg %p1028_p4 }
 0x15f   : > { %p1034_p0 = pnand %p1033_p12, %p1029_p13 }
 0x161   : > { %1037 = shalt.err (!%p1034_p0)
}
 0x162   : > { %900 = dma.vmem_to_hbm [thread:$0]  (%p1187_p9), %s701_s20, 64, %s698_s16, %s680_s14   ;;  %v665_v7 = vld [vmem:[#allocation2] sm:$0x3]  ;;  %vm667_vm3 = vcmask 1024   ;;  %vm671_vm4 = vcmask 9224  }
 0x163   : > { %s366_s13 = scalar_lea.vmem %s1321_s6, %s1254_s8 }
 0x1df   : > { %v646_v8 = vpop.xlane.xlu0 %645  ;;  %v664_v10 = vpop.xlane.xlu1 %663 }
 0x1e0   : > { %v666_v9 = vadd.f32 %v665_v7, %v646_v8 }
 0x1e2   : > { %668 = vst.msk [vmem:[#allocation2] sm:$0x3] %vm667_vm3, %v666_v9 }
 0x1e9   : > { %v669_v11 = vld [vmem:[#allocation2] sm:$0x3] }
 0x1ea   : > { %v670_v12 = vadd.f32 %v669_v11, %v664_v10 }
 0x1ec   : > { %672 = vst.msk [vmem:[#allocation2] sm:$0x3] %vm671_vm4, %v670_v12 }
 0x1f3   : > { %v676_v13 = vld [vmem:[#allocation2] sm:$0x3] }
 0x1f4   : > { %678 = vst.msk [vmem:[%s366_s13] sm:$0x3] %vm372_vm2, %v676_v13 }
 0x1f5 PF: > { %s715_s10 = sand.u32 1, %s1072_s21   ;;  %p1327_p9 = scmp.ge.s32.totalorder %s1092_s26, 2 }
 0x1f6   : > { %s716_s20 = scalar_lea.sflag [#allocation5], %s715_s10 }
 0x1f7   : > { %p907_p1 = pnand %p1327_p9, %p1194_p11 }
 0x1f9   : > { %p908_p3 = pneg %p907_p1 }
 0x1fb   : > { %1067 = dma.done.wait (%p908_p3), %s716_s20, 64  }
 0x1fc   : > { %1069 = vsyncadd (%p908_p3), %s716_s20, 4294967232  ;;  %s23_s26 = sadd.s32 1, %s1092_s26   ;;  %s1328_s21 = smov %s1076_s22 }
 0x1fd   : > { %p20_p5 = scmp.ge.s32.totalorder %s23_s26, 4   ;;  %s1329_s22 = smov %s1080_s23 }
 0x1fe   : > { %s1330_s23 = smov %s1192_s11  ;;  %s1331_s24 = smov %s1088_s25 }
 0x1ff   : > { %s1332_s25 = smov %s1334_s29  ;;  %22 = sbr.rel (!%p20_p5) target bundleno = 6 (0x6), region = 111 }
 0x204   :  { %728 = vsyncpa [#allocation4], 1 }
 0x205   :  { %730 = vsyncpa [#allocation4 + $0x1], 1 }
 0x206   :  { %731 = vsyncpa [#allocation5], 1 }
 0x207   :  { %733 = vsyncpa [#allocation5 + $0x1], 1 }

</bundles_post_ra>
